<compile_context>
chip_gen: v7x
topology: tpu7x:2x2x1
jax: 0.10.0
libtpu: 0.0.40
codegen_flags: <defaults>
</compile_context>

<pallas_src>
import jax
import jax.numpy as jnp
from jax.experimental import pallas as pl
from jax.experimental.pallas import tpu as pltpu


_SQRT_2_OVER_PI = 0.7978845608028654


def _gelu_tanh(x):
    # tanh-approximate GELU (EUP tanh).  Max abs error vs exact erf GELU ~1e-3.
    return 0.5 * x * (1.0 + jnp.tanh(_SQRT_2_OVER_PI * (x + 0.044715 * x * x * x)))


def regime_detector_kernel(x_ref, w1_ref, b1_ref, w2_ref, b2_ref, w3_ref, b3_ref, o_ref):
    # x: [input_dim, TN] bf16 — batch sits in the lane (fast) axis.
    x = x_ref[...]
    act_dtype = x.dtype

    # Layer 1: W1 @ x + b1 (f32 accumulate on the MXU), tanh-GELU in bf16.
    h1 = jnp.dot(w1_ref[...], x, preferred_element_type=jnp.float32) + b1_ref[...]
    h1 = _gelu_tanh(h1.astype(act_dtype))

    # Layer 2: W2 @ h1 + b2, tanh-GELU in bf16.
    h2 = jnp.dot(w2_ref[...], h1, preferred_element_type=jnp.float32) + b2_ref[...]
    h2 = _gelu_tanh(h2.astype(act_dtype))

    # Layer 3: logits = W3 @ h2 + b3  -> [num_regimes, TN] f32.
    logits = jnp.dot(w3_ref[...], h2, preferred_element_type=jnp.float32) + b3_ref[...]

    # Numerically stable softmax over the regime (sublane) axis — a 4-sublane
    # reduce (XLU).  Exact division so every column sums to 1.
    m = jnp.max(logits, axis=0, keepdims=True)
    e = jnp.exp(logits - m)
    denom = jnp.sum(e, axis=0, keepdims=True)
    o_ref[...] = (e / denom).astype(o_ref.dtype)


def regime_detector(x, params, *, tn=8192, compute_dtype=jnp.bfloat16):
    """x: [batch, input_dim] f32 -> regime probabilities [batch, num_regimes] f32.

    params are in native PyTorch nn.Linear layout: weights [out, in], biases [out].
    """
    w1, b1, w2, b2, w3, b3 = params
    batch, input_dim = x.shape
    num_regimes = w3.shape[0]

    LANES = 128  # batch lives in the lane axis now.
    rounded = pl.cdiv(batch, LANES) * LANES

    # Tile selection: large tiles amortize per-step overhead, but keep >= 2
    # grid steps when the batch allows it so v7x's two TensorCores both work.
    tn = min(tn, rounded)
    half = (rounded // 2 // LANES) * LANES
    if half >= LANES:
        tn = min(tn, half)
    tn = max(LANES, (tn // LANES) * LANES)
    padded = pl.cdiv(batch, tn) * tn

    # Wrapper-side layout plumbing: transpose to batch-in-lanes, cast to bf16
    # in the same pass (halves the written/streamed bytes), zero-pad the ragged
    # lane tail (padded columns give valid bias-only softmax columns that are
    # sliced off below).
    xt = x.T.astype(compute_dtype)
    if padded != batch:
        xt = jnp.pad(xt, ((0, 0), (0, padded - batch)))

    w1c, w2c, w3c = (w.astype(compute_dtype) for w in (w1, w2, w3))
    b1c, b2c, b3c = (b.reshape(-1, 1).astype(jnp.float32) for b in (b1, b2, b3))

    grid = (padded // tn,)

    # Constant index_map -> weights/biases are DMA'd once and stay VMEM-resident.
    def const(shape):
        return pl.BlockSpec(shape, lambda i: (0, 0))

    out_t = pl.pallas_call(
        regime_detector_kernel,
        out_shape=jax.ShapeDtypeStruct((num_regimes, padded), jnp.float32),
        grid=grid,
        in_specs=[
            pl.BlockSpec((input_dim, tn), lambda i: (0, i)),   # streamed x tiles
            const(w1c.shape), const(b1c.shape),
            const(w2c.shape), const(b2c.shape),
            const(w3c.shape), const(b3c.shape),
        ],
        # Lane-dense output slab: [num_regimes, TN] -> unmasked vst stream.
        out_specs=pl.BlockSpec((num_regimes, tn), lambda i: (0, i)),
        compiler_params=pltpu.CompilerParams(
            dimension_semantics=("parallel",),        # shard tiles across TCs (v7x)
            vmem_limit_bytes=32 * 1024 * 1024,        # explicit, safe on v5e..v7x
        ),
    )(xt, w1c, b1c, w2c, b2c, w3c, b3c)

    # Back to [batch, num_regimes]; the padded columns are dropped.
    return out_t[:, :batch].T


def init_params(key, input_dim, hidden_dim, num_regimes):
    """Deterministic synthetic parameters in PyTorch layout: w [out, in], b [out]."""
    ks = jax.random.split(key, 6)

    def lin(kw, kb, fan_in, fan_out):
        bound = 1.0 / (fan_in ** 0.5)
        w = jax.random.uniform(kw, (fan_out, fan_in), jnp.float32, -bound, bound)
        b = jax.random.uniform(kb, (fan_out,), jnp.float32, -bound, bound)
        return w, b

    w1, b1 = lin(ks[0], ks[1], input_dim, hidden_dim)
    w2, b2 = lin(ks[2], ks[3], hidden_dim, hidden_dim)
    w3, b3 = lin(ks[4], ks[5], hidden_dim, num_regimes)
    return (w1, b1, w2, b2, w3, b3)


def regime_detector_ref(x, params, *, compute_dtype=jnp.float32, exact_gelu=True):
    """Pure-JAX reference.

    compute_dtype=f32 + exact_gelu=True  -> PyTorch nn.Sequential semantics.
    compute_dtype=bf16 + exact_gelu=False -> mirrors the kernel's casts/GELU.
    """
    w1, b1, w2, b2, w3, b3 = params
    cd = compute_dtype
    act = (lambda v: jax.nn.gelu(v, approximate=False)) if exact_gelu else _gelu_tanh

    h1 = jnp.dot(x.astype(cd), w1.T.astype(cd), preferred_element_type=jnp.float32) + b1
    h1 = act(h1.astype(cd))
    h2 = jnp.dot(h1.astype(cd), w2.T.astype(cd), preferred_element_type=jnp.float32) + b2
    h2 = act(h2.astype(cd))
    logits = jnp.dot(h2.astype(cd), w3.T.astype(cd), preferred_element_type=jnp.float32) + b3
    return jax.nn.softmax(logits, axis=-1)


if __name__ == "__main__":
    batch, input_dim, hidden_dim, num_regimes = 8, 16, 32, 4

    key = jax.random.PRNGKey(0)
    kx, kp = jax.random.split(key)
    x = jax.random.normal(kx, (batch, input_dim), jnp.float32)
    params = init_params(kp, input_dim, hidden_dim, num_regimes)

    out = jax.block_until_ready(regime_detector(x, params))
    assert out.shape == (batch, num_regimes)

    # Tight check against a reference that mirrors the kernel's bf16 + tanh-GELU math.
    ref_mirror = regime_detector_ref(x, params, compute_dtype=jnp.bfloat16, exact_gelu=False)
    assert jnp.allclose(out, ref_mirror, atol=5e-3, rtol=5e-3), "mismatch vs kernel-math reference"

    # Looser check against full-f32, exact-erf GELU (PyTorch-equivalent) math.
    ref_f32 = regime_detector_ref(x, params, compute_dtype=jnp.float32, exact_gelu=True)
    assert jnp.allclose(out, ref_f32, atol=3e-2, rtol=3e-2), "mismatch vs f32 reference"

    # Valid probability distribution per row (exact division in the kernel).
    assert jnp.allclose(jnp.sum(out, axis=-1), 1.0, atol=1e-3), "softmax rows must sum to 1"
    assert bool(jnp.all(out >= 0.0)), "probabilities must be non-negative"

    print("KERNEL_OK")
</pallas_src>

<mosaic_0001>
module attributes {stable_mosaic.version = 11 : i64} {
  func.func @regime_detector_kernel(%arg0: i32, %arg1: memref<16x128xbf16, #tpu.memory_space<vmem>>, %arg2: memref<32x16xbf16, #tpu.memory_space<vmem>>, %arg3: memref<32x1xf32, #tpu.memory_space<vmem>>, %arg4: memref<32x32xbf16, #tpu.memory_space<vmem>>, %arg5: memref<32x1xf32, #tpu.memory_space<vmem>>, %arg6: memref<4x32xbf16, #tpu.memory_space<vmem>>, %arg7: memref<4x1xf32, #tpu.memory_space<vmem>>, %arg8: memref<4x128xf32, #tpu.memory_space<vmem>>) attributes {dimension_semantics = [#tpu.dimension_semantics<parallel>], iteration_bounds = array<i64: 1>, scalar_prefetch = 0 : i64, scratch_operands = 0 : i64, tpu.core_type = #tpu.core_type<tc>, window_params = [{transform_indices = @transform_0, window_bounds = array<i64: 16, 128>}, {pipeline_mode = #tpu.pipeline_mode<synchronous>, transform_indices = @transform_1, window_bounds = array<i64: 32, 16>}, {pipeline_mode = #tpu.pipeline_mode<synchronous>, transform_indices = @transform_2, window_bounds = array<i64: 32, 1>}, {pipeline_mode = #tpu.pipeline_mode<synchronous>, transform_indices = @transform_3, window_bounds = array<i64: 32, 32>}, {pipeline_mode = #tpu.pipeline_mode<synchronous>, transform_indices = @transform_4, window_bounds = array<i64: 32, 1>}, {pipeline_mode = #tpu.pipeline_mode<synchronous>, transform_indices = @transform_5, window_bounds = array<i64: 4, 32>}, {pipeline_mode = #tpu.pipeline_mode<synchronous>, transform_indices = @transform_6, window_bounds = array<i64: 4, 1>}, {transform_indices = @transform_7, window_bounds = array<i64: 4, 128>}]} {
    %c0 = arith.constant 0 : index
    %c0_0 = arith.constant 0 : index
    %0 = vector.load %arg1[%c0, %c0_0] : memref<16x128xbf16, #tpu.memory_space<vmem>>, vector<16x128xbf16>
    %c0_1 = arith.constant 0 : index
    %c0_2 = arith.constant 0 : index
    %1 = vector.load %arg2[%c0_1, %c0_2] : memref<32x16xbf16, #tpu.memory_space<vmem>>, vector<32x16xbf16>
    %cst = arith.constant dense<0.000000e+00> : vector<32x128xf32>
    %2 = tpu.matmul %1, %0, %cst {dimension_numbers = #tpu.dot_dimension_numbers<[1], [0], [0], [1], [0, 0, 1, 1], [], []>} : vector<32x16xbf16>, vector<16x128xbf16>, vector<32x128xf32> -> vector<32x128xf32>
    %c0_3 = arith.constant 0 : index
    %c0_4 = arith.constant 0 : index
    %3 = vector.load %arg3[%c0_3, %c0_4] : memref<32x1xf32, #tpu.memory_space<vmem>>, vector<32x1xf32>
    %4 = vector.broadcast %3 : vector<32x1xf32> to vector<32x128xf32>
    %5 = arith.addf %2, %4 : vector<32x128xf32>
    %6 = arith.truncf %5 : vector<32x128xf32> to vector<32x128xbf16>
    %cst_5 = arith.constant 5.000000e-01 : bf16
    %7 = vector.broadcast %cst_5 : bf16 to vector<32x128xbf16>
    %8 = arith.mulf %7, %6 : vector<32x128xbf16>
    %cst_6 = arith.constant 4.467770e-02 : bf16
    %9 = vector.broadcast %cst_6 : bf16 to vector<32x128xbf16>
    %10 = arith.mulf %9, %6 : vector<32x128xbf16>
    %11 = arith.mulf %10, %6 : vector<32x128xbf16>
    %12 = arith.mulf %11, %6 : vector<32x128xbf16>
    %13 = arith.addf %6, %12 : vector<32x128xbf16>
    %cst_7 = arith.constant 7.968750e-01 : bf16
    %14 = vector.broadcast %cst_7 : bf16 to vector<32x128xbf16>
    %15 = arith.mulf %14, %13 : vector<32x128xbf16>
    %16 = math.tanh %15 : vector<32x128xbf16>
    %cst_8 = arith.constant 1.000000e+00 : bf16
    %17 = vector.broadcast %cst_8 : bf16 to vector<32x128xbf16>
    %18 = arith.addf %17, %16 : vector<32x128xbf16>
    %19 = arith.mulf %8, %18 : vector<32x128xbf16>
    %c0_9 = arith.constant 0 : index
    %c0_10 = arith.constant 0 : index
    %20 = vector.load %arg4[%c0_9, %c0_10] : memref<32x32xbf16, #tpu.memory_space<vmem>>, vector<32x32xbf16>
    %cst_11 = arith.constant dense<0.000000e+00> : vector<32x128xf32>
    %21 = tpu.matmul %20, %19, %cst_11 {dimension_numbers = #tpu.dot_dimension_numbers<[1], [0], [0], [1], [0, 0, 1, 1], [], []>} : vector<32x32xbf16>, vector<32x128xbf16>, vector<32x128xf32> -> vector<32x128xf32>
    %c0_12 = arith.constant 0 : index
    %c0_13 = arith.constant 0 : index
    %22 = vector.load %arg5[%c0_12, %c0_13] : memref<32x1xf32, #tpu.memory_space<vmem>>, vector<32x1xf32>
    %23 = vector.broadcast %22 : vector<32x1xf32> to vector<32x128xf32>
    %24 = arith.addf %21, %23 : vector<32x128xf32>
    %25 = arith.truncf %24 : vector<32x128xf32> to vector<32x128xbf16>
    %cst_14 = arith.constant 5.000000e-01 : bf16
    %26 = vector.broadcast %cst_14 : bf16 to vector<32x128xbf16>
    %27 = arith.mulf %26, %25 : vector<32x128xbf16>
    %cst_15 = arith.constant 4.467770e-02 : bf16
    %28 = vector.broadcast %cst_15 : bf16 to vector<32x128xbf16>
    %29 = arith.mulf %28, %25 : vector<32x128xbf16>
    %30 = arith.mulf %29, %25 : vector<32x128xbf16>
    %31 = arith.mulf %30, %25 : vector<32x128xbf16>
    %32 = arith.addf %25, %31 : vector<32x128xbf16>
    %cst_16 = arith.constant 7.968750e-01 : bf16
    %33 = vector.broadcast %cst_16 : bf16 to vector<32x128xbf16>
    %34 = arith.mulf %33, %32 : vector<32x128xbf16>
    %35 = math.tanh %34 : vector<32x128xbf16>
    %cst_17 = arith.constant 1.000000e+00 : bf16
    %36 = vector.broadcast %cst_17 : bf16 to vector<32x128xbf16>
    %37 = arith.addf %36, %35 : vector<32x128xbf16>
    %38 = arith.mulf %27, %37 : vector<32x128xbf16>
    %c0_18 = arith.constant 0 : index
    %c0_19 = arith.constant 0 : index
    %39 = vector.load %arg6[%c0_18, %c0_19] : memref<4x32xbf16, #tpu.memory_space<vmem>>, vector<4x32xbf16>
    %cst_20 = arith.constant dense<0.000000e+00> : vector<4x128xf32>
    %40 = tpu.matmul %39, %38, %cst_20 {dimension_numbers = #tpu.dot_dimension_numbers<[1], [0], [0], [1], [0, 0, 1, 1], [], []>} : vector<4x32xbf16>, vector<32x128xbf16>, vector<4x128xf32> -> vector<4x128xf32>
    %c0_21 = arith.constant 0 : index
    %c0_22 = arith.constant 0 : index
    %41 = vector.load %arg7[%c0_21, %c0_22] : memref<4x1xf32, #tpu.memory_space<vmem>>, vector<4x1xf32>
    %42 = vector.broadcast %41 : vector<4x1xf32> to vector<4x128xf32>
    %43 = arith.addf %40, %42 : vector<4x128xf32>
    %cst_23 = arith.constant dense<0xFF800000> : vector<128xf32>
    %44 = vector.multi_reduction <maximumf>, %43, %cst_23 [0] : vector<4x128xf32> to vector<128xf32>
    %45 = vector.shape_cast %44 : vector<128xf32> to vector<1x128xf32>
    %46 = vector.broadcast %45 : vector<1x128xf32> to vector<4x128xf32>
    %47 = arith.subf %43, %46 : vector<4x128xf32>
    %48 = math.exp %47 : vector<4x128xf32>
    %cst_24 = arith.constant dense<0.000000e+00> : vector<128xf32>
    %49 = vector.multi_reduction <add>, %48, %cst_24 [0] : vector<4x128xf32> to vector<128xf32>
    %50 = vector.shape_cast %49 : vector<128xf32> to vector<1x128xf32>
    %51 = vector.broadcast %50 : vector<1x128xf32> to vector<4x128xf32>
    %52 = arith.divf %48, %51 : vector<4x128xf32>
    %c0_25 = arith.constant 0 : index
    %c0_26 = arith.constant 0 : index
    %53 = vector.load %arg8[%c0_25, %c0_26] : memref<4x128xf32, #tpu.memory_space<vmem>>, vector<4x128xf32>
    tpu.vector_store %arg8[%c0_25, %c0_26], %52 {strides = array<i32>} : memref<4x128xf32, #tpu.memory_space<vmem>>, vector<4x128xf32>,
    return
  }
  func.func @transform_0(%arg0: i32) -> (i32, i32) {
    %c0_i32 = arith.constant 0 : i32
    %c0_i32_0 = arith.constant 0 : i32
    return %c0_i32, %arg0 : i32, i32
  }
  func.func @transform_1(%arg0: i32) -> (i32, i32) {
    %c0_i32 = arith.constant 0 : i32
    %c0_i32_0 = arith.constant 0 : i32
    %c0_i32_1 = arith.constant 0 : i32
    return %c0_i32, %c0_i32_0 : i32, i32
  }
  func.func @transform_2(%arg0: i32) -> (i32, i32) {
    %c0_i32 = arith.constant 0 : i32
    %c0_i32_0 = arith.constant 0 : i32
    %c0_i32_1 = arith.constant 0 : i32
    return %c0_i32, %c0_i32_0 : i32, i32
  }
  func.func @transform_3(%arg0: i32) -> (i32, i32) {
    %c0_i32 = arith.constant 0 : i32
    %c0_i32_0 = arith.constant 0 : i32
    %c0_i32_1 = arith.constant 0 : i32
    return %c0_i32, %c0_i32_0 : i32, i32
  }
  func.func @transform_4(%arg0: i32) -> (i32, i32) {
    %c0_i32 = arith.constant 0 : i32
    %c0_i32_0 = arith.constant 0 : i32
    %c0_i32_1 = arith.constant 0 : i32
    return %c0_i32, %c0_i32_0 : i32, i32
  }
  func.func @transform_5(%arg0: i32) -> (i32, i32) {
    %c0_i32 = arith.constant 0 : i32
    %c0_i32_0 = arith.constant 0 : i32
    %c0_i32_1 = arith.constant 0 : i32
    return %c0_i32, %c0_i32_0 : i32, i32
  }
  func.func @transform_6(%arg0: i32) -> (i32, i32) {
    %c0_i32 = arith.constant 0 : i32
    %c0_i32_0 = arith.constant 0 : i32
    %c0_i32_1 = arith.constant 0 : i32
    return %c0_i32, %c0_i32_0 : i32, i32
  }
  func.func @transform_7(%arg0: i32) -> (i32, i32) {
    %c0_i32 = arith.constant 0 : i32
    %c0_i32_0 = arith.constant 0 : i32
    return %c0_i32, %arg0 : i32, i32
  }
}

</mosaic_0001>

<bundles_post_ra>
// kernel: tpu_custom_call.1
= control target key start
LH: loop header
LB: loop body
LE: loop exit
PB: predicated region body
PF: predicated region fallthrough
CT: control target
= control target key end

     0   :  { %vm78_vm0 = vcmask 130048   ;;  %v442_v3 = vmov 0   ;;  %s548_s0 = inlined_call_operand.vmem [shape: bf16[16,128], index: 0, kind: input, shape index: {}]   ;;  %s549_s1 = inlined_call_operand.vmem [shape: bf16[32,16], index: 1, kind: input, shape index: {}]   ;;  %s550_s2 = inlined_call_operand.vmem [shape: f32[32,1], index: 2, kind: input, shape index: {}]   ;;  %s551_s3 = inlined_call_operand.vmem [shape: bf16[32,32], index: 3, kind: input, shape index: {}]   ;;  %s552_s4 = inlined_call_operand.vmem [shape: f32[32,1], index: 4, kind: input, shape index: {}]   ;;  %s553_s5 = inlined_call_operand.vmem [shape: bf16[4,32], index: 5, kind: input, shape index: {}]   ;;  %s554_s6 = inlined_call_operand.vmem [shape: f32[4,1], index: 6, kind: input, shape index: {}]   ;;  %s555_s7 = inlined_call_operand.hbm [shape: f32[4,128], index: 7, kind: output, shape index: {}]  }
   0x1   :  { %v401_v0 = vld [vmem:[%s548_s0] sm:$0xff]   ;;  %v403_v2 = vld [vmem:[%s549_s1 + $0x8] sm:$0xff]   ;;  %399 = vset.pattern.permute.xlu0 %v442_v3  ;;  %v40_v5 = vld [vmem:[%s550_s2 + $0x10] sm:$0xff]  ;;  %400 = vset.pattern.permute.xlu1 %v442_v3 }
   0x2   :  { %v402_v1 = vld [vmem:[%s549_s1] sm:$0xff]   ;;  %373 = vmatprep.subr.bf16.mxu0 %v401_v0  ;;  %v39_v6 = vld [vmem:[%s550_s2 + $0x8] sm:$0xff]  ;;  %54 = vperm.xlu1 %400, %v40_v5   ;;  %v41_v7 = vld [vmem:[%s550_s2 + $0x18] sm:$0xff] }
   0x3   :  { %374 = vmatpush3.bf16.msra.mxu0 %v401_v0  ;;  %375 = vmatprep.mubr.msk.bf16.mxu0 %vm78_vm0, %v402_v1  ;;  %v38_v4 = vld [vmem:[%s550_s2] sm:$0xff] }
   0x4   :  { %44 = vperm.xlu0 %399, %v38_v4  }
   0x6   :  { %376 = vmatmul.mubr.msk.bf16.vlgmr.msra.gmra.mrb[0].mxu0 %vm78_vm0, %v403_v2 }
   0x7   :  { %12 = vsyncpa [#allocation3], 0  ;;  %v158_v8 = vld [vmem:[%s552_s4] sm:$0xff]  ;;  %59 = vperm.xlu1 %400, %v41_v7   ;;  %v159_v9 = vld [vmem:[%s552_s4 + $0x8] sm:$0xff]  ;;  %vm192_vm1 = vcmask 261120   ;;  %v443_v47 = vmov 0.0  }
   0x8   :  { %49 = vperm.xlu0 %399, %v39_v6   ;;  %v160_v10 = vld [vmem:[%s552_s4 + $0x10] sm:$0xff]  ;;  %v161_v11 = vld [vmem:[%s552_s4 + $0x18] sm:$0xff]  ;;  %v269_v12 = vld [vmem:[%s554_s6] sm:$0xf]  ;;  %387 = vmatprep.subr.bf16.mxu0 %v443_v47  ;;  %vm444_vm2 = vmmov 0   ;;  %vm318_vm3 = vcmask 1043456  }
   0x9   :  { %v404_v13 = vld [vmem:[%s551_s3] sm:$0xff]   ;;  %v405_v46 = vld [vmem:[%s551_s3 + $0x8] sm:$0xff]   ;;  %391 = vmatprep.mubr.msk.bf16.mxu0 %vm444_vm2, %v443_v47 }
   0xa   :  { %383 = vmatprep.mubr.msk.bf16.mxu1 %vm192_vm1, %v404_v13 }
   0xb   :  { %169 = vperm.xlu1 %400, %v159_v9  }
   0xc   :  { %164 = vperm.xlu0 %399, %v158_v8  }
   0xf   :  { %179 = vperm.xlu1 %400, %v161_v11  }
  0x10   :  { %174 = vperm.xlu0 %399, %v160_v10  }
  0x14   :  { %272 = vperm.xlu0 %399, %v269_v12  }
  0x81   :  { %v55_v14 = vpop.permute.xlu1 %54 }
  0x83   :  { %v45_v15 = vpop.permute.xlu0 %44 }
  0x86   :  { %v60_v18 = vpop.permute.xlu1 %59 }
  0x87   :  { %v50_v20 = vpop.permute.xlu0 %49 }
  0x8a   :  { %v170_v49 = vpop.permute.xlu1 %169 }
  0x8b   :  { %v165_v48 = vpop.permute.xlu0 %164 }
  0x8e   :  { %v180_v53 = vpop.permute.xlu1 %179 }
  0x8f   :  { %v175_v51 = vpop.permute.xlu0 %174 }
  0xd9   :  { %v377_v16 = vpop.f32.mrb[0].mxu0 }
  0xda   :  { %v119_v17 = vpop.f32.mrb[1].mxu0  ;;  %v128_v21 = vadd.f32 %v377_v16, %v55_v14  ;;  %v268_v16 = vld [vmem:[%s553_s5] sm:$0x3]  ;;  %s445_s5 = smov [#allocation2]  }
  0xdb   :  { %v378_v19 = vpop.f32.mrb[2].mxu0  ;;  %v120_v24 = vadd.f32 %v119_v17, %v45_v15  ;;  %v273_v17 = vpop.permute.xlu0 %272  ;;  %s345_s25 = sshll.u32 %s445_s5, 4  ;;  %s346_s25 = int_to_ptr.vmem [resolvable:$true] %s345_s25 }
  0xdc   :  { %v131_v22 = vadd.f32 %v378_v19, %v60_v18  ;;  %v122_v23 = vpop.f32.mrb[3].mxu0  ;;  %s418_s26 = scalar_lea.vmem %s346_s25, 64  ;;  %p423_p1 = scmp.lt.s32.totalorder %s346_s25, %s346_s25 }
  0xdd   :  { %v123_v25 = vadd.f32 %v122_v23, %v50_v20  ;;  %p419_p0 = scmp.ne.s32.totalorder %s346_s25, %s418_s26  ;;  %p424_p2 = scmp.lt.s32.totalorder %s418_s26, %s418_s26 }
  0xde   :  { %v135_v26 = vpack.c.bf16 %v131_v22, %v128_v21 }
  0xdf   :  { %v134_v27 = vpack.c.bf16 %v123_v25, %v120_v24  ;;  %p425_p3 = por %p424_p2, %p423_p1 }
  0xe0   :  { %v139_v28 = vmul.bf16 1027030327, %v135_v26  ;;  %v137_v44 = vmul.bf16 1056980736, %v135_v26 }
  0xe1   :  { %v138_v29 = vmul.bf16 1027030327, %v134_v27  ;;  %v136_v40 = vmul.bf16 1056980736, %v134_v27  ;;  %p426_p4 = pnand %p425_p3, %p419_p0 }
  0xe2   :  { %v141_v30 = vmul.bf16 %v139_v28, %v135_v26 }
  0xe3   :  { %v140_v31 = vmul.bf16 %v138_v29, %v134_v27 }
  0xe4   :  { %v143_v32 = vmul.bf16 %v141_v30, %v135_v26 }
  0xe5   :  { %v142_v33 = vmul.bf16 %v140_v31, %v134_v27 }
  0xe6   :  { %v145_v34 = vadd.bf16 %v143_v32, %v135_v26 }
  0xe7   :  { %v144_v35 = vadd.bf16 %v142_v33, %v134_v27 }
  0xe8   :  { %v147_v36 = vmul.bf16 1061961548, %v145_v34 }
  0xe9   :  { %v146_v37 = vmul.bf16 1061961548, %v144_v35 }
  0xea   :  { %406 = vtanh.bf16 %v147_v36 }
  0xeb   :  { %408 = vtanh.bf16 %v146_v37 }
  0xf5   :  { %v407_v38 = vpop.eup %406 }
  0xf6   :  { %v409_v39 = vpop.eup %408  ;;  %v151_v42 = vadd.bf16 1065369472, %v407_v38 }
  0xf7   :  { %v150_v41 = vadd.bf16 1065369472, %v409_v39 }
  0xf8   :  { %v153_v45 = vmul.bf16 %v151_v42, %v137_v44 }
  0xf9   :  { %v152_v43 = vmul.bf16 %v150_v41, %v136_v40 }
  0xfb   :  { %379 = vmatprep.subr.bf16.mxu1 %v152_v43 }
  0xfc   :  { %380 = vmatpush3.bf16.msra.mxu1 %v152_v43 }
  0xfd   :  { %381 = vmatprep.subr.bf16.mxu1 %v153_v45 }
 0x100   :  { %382 = vmatpush3.bf16.msra.mxu1 %v153_v45 }
 0x103   :  { %384 = vmatmul.mubr.msk.bf16.vlgmr.msra.gmra.mrb[0].mxu1 %vm192_vm1, %v405_v46 }
 0x1d6   :  { %v385_v50 = vpop.f32.mrb[0].mxu1 }
 0x1d7   :  { %v233_v52 = vpop.f32.mrb[1].mxu1  ;;  %v242_v55 = vadd.f32 %v385_v50, %v175_v51 }
 0x1d8   :  { %v386_v54 = vpop.f32.mrb[2].mxu1  ;;  %v234_v58 = vadd.f32 %v233_v52, %v165_v48 }
 0x1d9   :  { %v245_v56 = vadd.f32 %v386_v54, %v180_v53  ;;  %v236_v57 = vpop.f32.mrb[3].mxu1 }
 0x1da   :  { %v237_v59 = vadd.f32 %v236_v57, %v170_v49 }
 0x1db   :  { %v249_v60 = vpack.c.bf16 %v245_v56, %v242_v55 }
 0x1dc   :  { %v248_v61 = vpack.c.bf16 %v237_v59, %v234_v58 }
 0x1dd   :  { %v253_v62 = vmul.bf16 1027030327, %v249_v60  ;;  %v251_v14 = vmul.bf16 1056980736, %v249_v60 }
 0x1de   :  { %v252_v63 = vmul.bf16 1027030327, %v248_v61  ;;  %v250_v10 = vmul.bf16 1056980736, %v248_v61 }
 0x1df   :  { %v255_v0 = vmul.bf16 %v253_v62, %v249_v60 }
 0x1e0   :  { %v254_v1 = vmul.bf16 %v252_v63, %v248_v61 }
 0x1e1   :  { %v257_v2 = vmul.bf16 %v255_v0, %v249_v60 }
 0x1e2   :  { %v256_v3 = vmul.bf16 %v254_v1, %v248_v61 }
 0x1e3   :  { %v259_v4 = vadd.bf16 %v257_v2, %v249_v60 }
 0x1e4   :  { %v258_v5 = vadd.bf16 %v256_v3, %v248_v61 }
 0x1e5   :  { %v261_v6 = vmul.bf16 1061961548, %v259_v4 }
 0x1e6   :  { %v260_v7 = vmul.bf16 1061961548, %v258_v5 }
 0x1e7   :  { %410 = vtanh.bf16 %v261_v6 }
 0x1e8   :  { %412 = vtanh.bf16 %v260_v7 }
 0x1f2   :  { %v411_v8 = vpop.eup %410 }
 0x1f3   :  { %v413_v9 = vpop.eup %412  ;;  %v265_v13 = vadd.bf16 1065369472, %v411_v8 }
 0x1f4   :  { %v264_v11 = vadd.bf16 1065369472, %v413_v9 }
 0x1f5   :  { %v267_v15 = vmul.bf16 %v265_v13, %v251_v14 }
 0x1f6   :  { %v266_v12 = vmul.bf16 %v264_v11, %v250_v10 }
 0x1f8   :  { %388 = vmatpush3.bf16.msra.mxu0 %v266_v12 }
 0x1f9   :  { %389 = vmatprep.subr.bf16.mxu0 %v443_v47 }
 0x1fc   :  { %390 = vmatpush3.bf16.msra.mxu0 %v267_v15 }
 0x1ff   :  { %392 = vmatmul.mubr.msk.bf16.vlgmr.msra.gmra.mrb[4].mxu0 %vm192_vm1, %v268_v16 }
 0x2d2   :  { %v312_v18 = vpop.f32.mrb[4].mxu0 }
 0x2d3   :  { %v313_v19 = vadd.f32 %v312_v18, %v273_v17  ;;  %v393_v20 = vpop.f32.mrb[5].mxu0 }
 0x2d4   :  { %v315_v21 = vpop.f32.mrb[6].mxu0 }
 0x2d5   :  { %v319_v22 = vsel %vm318_vm3, %v313_v19, -inf  ;;  %v394_v23 = vpop.f32.mrb[7].mxu0 }
 0x2d6   :  { %v320_v24 = vrot.slane %v319_v22, 4 }
 0x2d8   :  { %v321_v25 = vmax.f32 %v319_v22, %v320_v24 }
 0x2da   :  { %v322_v26 = vrot.slane %v321_v25, 2 }
 0x2dc   :  { %v323_v27 = vmax.f32 %v321_v25, %v322_v26 }
 0x2de   :  { %v324_v28 = vrot.slane %v323_v27, 1 }
 0x2e0   :  { %v325_v29 = vmax.f32 %v323_v27, %v324_v28 }
 0x2e2   :  { %v326_v30 = vsub.f32 %v313_v19, %v325_v29 }
 0x2e4   :  { %v327_v31 = vmul.f32 1.442695, %v326_v30 }
 0x2e6   :  { %414 = vpow2.f32 %v327_v31 }
 0x2f0   :  { %v415_v32 = vpop.eup %414 }
 0x2f1   :  { %v329_v33 = vsel %vm318_vm3, %v415_v32, 0.0 }
 0x2f2   :  { %v330_v34 = vrot.slane %v329_v33, 4 }
 0x2f4   :  { %v331_v35 = vadd.f32 %v330_v34, %v329_v33 }
 0x2f6   :  { %v332_v36 = vrot.slane %v331_v35, 2 }
 0x2f8   :  { %v333_v37 = vadd.f32 %v332_v36, %v331_v35 }
 0x2fa   :  { %v334_v38 = vrot.slane %v333_v37, 1 }
 0x2fc   :  { %v335_v39 = vadd.f32 %v334_v38, %v333_v37 }
 0x2fe   :  { %416 = vrcp.f32 %v335_v39 }
 0x308   :  { %v417_v40 = vpop.eup %416 }
 0x309   :  { %v337_v41 = vmul.f32 %v417_v40, %v415_v32 }
 0x30b   :  { %338 = vst [vmem:[#allocation2] sm:$0xf] %v337_v41 }
 0x30c   :  { %429 = shalt.err (!%p426_p4)
}
 0x30d   :  { %s430_s29 = scalar_lea.hbm %s555_s7, 64 }
 0x30e   :  { %p431_p5 = scmp.ne.s32.totalorder %s555_s7, %s430_s29  ;;  %p434_p6 = scmp.lt.u32.totalorder %s430_s29, %s555_s7 }
 0x310   :  { %p436_p7 = pnand %p434_p6, %p431_p5 }
 0x312   :  { %439 = shalt.err (!%p436_p7)
}
 0x313   :  { %348 = dma.vmem_to_hbm [thread:$0]  %s346_s25, 64, %s555_s7, [#allocation3]  }
 0x314   :  { %440 = dma.done.wait [#allocation3], 64  }
 0x315   :  { %441 = vsyncadd [#allocation3], 4294967232 }
 0x316   :  { %352 = vsyncpa [#allocation3], 1 }

</bundles_post_ra>
